<compile_context>
chip_gen: v7x
topology: tpu7x:2x2x1
jax: 0.10.0
libtpu: 0.0.40
codegen_flags: <defaults>
</compile_context>

<pallas_src>
import math
from functools import partial

import jax
import jax.numpy as jnp
from jax import lax
from jax.experimental import pallas as pl
from jax.experimental.pallas import tpu as pltpu

_LOG10000 = math.log(10000.0)


# -----------------------------------------------------------------------------
# Small helpers
# -----------------------------------------------------------------------------
def _round_up(x: int, m: int) -> int:
    return (x + m - 1) // m * m


def _sublane_gran(dtype) -> int:
    """Sublane granularity: 8 for 4-byte, 16 for 2-byte, 32 for 1-byte dtypes."""
    return max(8, 32 // jnp.dtype(dtype).itemsize)


def _tpu_budgets():
    """(per-stream tile target bytes, scoped vmem_limit_bytes), per TPU generation."""
    try:
        vmem = pltpu.get_tpu_info().vmem_capacity_bytes
    except Exception:
        vmem = 64 * 1024 * 1024  # be conservative (v7x-sized) if the query fails
    if vmem >= 100 * 1024 * 1024:            # v5e / v6e: 128 MiB physical VMEM
        return 16 * 1024 * 1024, 72 * 1024 * 1024
    return 8 * 1024 * 1024, 40 * 1024 * 1024  # v7x: 64 MiB physical VMEM


def _pick_row_tile(rows: int, row_bytes: int, gran: int, target: int) -> int:
    """Largest row tile (multiple of gran, or full extent) within target bytes."""
    if rows * row_bytes <= target:
        ts = rows
    else:
        ts = max(gran, (target // max(row_bytes, 1)) // gran * gran)
        ts = min(ts, rows)
    # Give v7x's two TensorCores at least two row tiles when the shape allows it
    # (only ~0.35us extra step overhead on single-TC v5e/v6e).
    if ts == rows and rows >= 2 * gran:
        ts = _round_up((rows + 1) // 2, gran)
    return ts


def _pick_fold(S: int, BD: int) -> int:
    """Fold factor k (k | S): rows folded into the lane dim so k*BD is 128-aligned.

    Only used when the lane width B*D is small/unaligned (masked-store avoidance);
    returns 1 when B*D is already a multiple of 128 or large enough that masked-lane
    waste is negligible.
    """
    if BD % 128 == 0 or BD >= 1024:
        return 1
    fallback = 1
    for k in range(2, min(S, 128) + 1):
        if S % k:
            continue
        if (k * BD) % 128 == 0:
            return k                          # smallest exact fold
        if fallback == 1 and k * BD >= 128:
            fallback = k                      # at least reach a full vreg of lanes
    return fallback


# -----------------------------------------------------------------------------
# PE buffer, identical to the PyTorch __init__ construction.
# -----------------------------------------------------------------------------
def make_positional_encoding(max_len: int, d_model: int) -> jnp.ndarray:
    position = jnp.arange(max_len, dtype=jnp.float32)[:, None]            # (max_len, 1)
    div_term = jnp.exp(jnp.arange(0, d_model, 2, dtype=jnp.float32)
                       * (-_LOG10000 / d_model))
    pe = jnp.zeros((max_len, d_model), dtype=jnp.float32)
    pe = pe.at[:, 0::2].set(jnp.sin(position * div_term))
    pe = pe.at[:, 1::2].set(jnp.cos(position * div_term[: d_model // 2]))
    return pe[:, None, :]                                                  # (max_len, 1, D)


# -----------------------------------------------------------------------------
# Fused path (B < 8): lane-dense 2-D tiles, pe rebuilt in-kernel with one sin/elem.
# -----------------------------------------------------------------------------
def _pe_fused_kernel(x_ref, freq_ref, offs_ref, o_ref, *, row_tile, fold, reps):
    rows = x_ref.shape[0]
    # Absolute sequence position of the first element of every folded row.
    base = ((pl.program_id(0) * row_tile
             + lax.broadcasted_iota(jnp.int32, (rows, 1), 0)) * fold).astype(jnp.float32)
    # One transcendental per element: cos(t) == sin(t + pi/2) via the phase constant.
    pe = jnp.sin(base * freq_ref[...] + offs_ref[...])
    if reps > 1:
        # sin was evaluated once per (rows, D) slab; lane-tile it across the batch.
        pe = jnp.tile(pe, (1, reps))
    o_ref[...] = (x_ref[...] + pe).astype(o_ref.dtype)


def _forward_fused(x: jnp.ndarray, *, donate: bool = False) -> jnp.ndarray:
    S, B, D = x.shape
    BD = B * D
    itemsize = jnp.dtype(x.dtype).itemsize
    gran = _sublane_gran(x.dtype)
    target, vmem_limit = _tpu_budgets()

    # Fold rows into lanes when B*D is small/unaligned -> lane-dense (unmasked) stores.
    fold = _pick_fold(S, BD)
    rows, cols = S // fold, fold * BD
    x2d = x.reshape(rows, cols)                       # row-major reshape: free

    # Lane (column) grid axis only if even a single sublane-granule of rows blows VMEM.
    need_col_tiling = _round_up(cols, 128) * itemsize * gran > target
    if need_col_tiling:
        col_tile = max(128, ((target // (gran * itemsize)) // 128) * 128)
        col_tile = min(col_tile, (cols // 128) * 128)
        row_bytes = col_tile * itemsize
    else:
        col_tile = cols
        row_bytes = _round_up(cols, 128) * itemsize
    ts = _pick_row_tile(rows, row_bytes, gran, target)

    # Evaluate sin once per (rows, D) slab and tile over batch when layout allows.
    slab = (fold == 1) and (not need_col_tiling) and (B >= 2) and (D % 128 == 0)

    # Resident per-column constants (the div_term precompute + phase trick).
    d_idx = jnp.arange(D, dtype=jnp.float32)
    parity = jnp.remainder(d_idx, 2.0)
    inv_freq_d = jnp.exp((d_idx - parity) * (-_LOG10000 / D))   # exp(2*floor(d/2)*-ln(1e4)/D)
    phase_d = parity * (math.pi / 2.0)                          # pi/2 on odd feature cols
    if slab:
        freq_col = inv_freq_d[None, :]                          # (1, D)
        offs_col = phase_d[None, :]
    else:
        freq_flat = jnp.tile(jnp.tile(inv_freq_d, B), fold)     # (fold*B*D,)
        phase_flat = jnp.tile(jnp.tile(phase_d, B), fold)
        j = jnp.repeat(jnp.arange(fold, dtype=jnp.float32), BD)  # intra-fold position
        freq_col = freq_flat[None, :]
        offs_col = (j * freq_flat + phase_flat)[None, :]         # (1, fold*B*D)

    const_cols = freq_col.shape[1]
    if need_col_tiling:
        const_block = (1, col_tile)
        const_map = lambda i, j: (0, j)
    else:
        const_block = (1, const_cols)
        const_map = lambda i, j: (0, 0)

    grid = (pl.cdiv(rows, ts), pl.cdiv(cols, col_tile))

    out2d = pl.pallas_call(
        partial(_pe_fused_kernel, row_tile=ts, fold=fold, reps=(B if slab else 1)),
        out_shape=jax.ShapeDtypeStruct((rows, cols), x.dtype),
        grid_spec=pltpu.PrefetchScalarGridSpec(
            num_scalar_prefetch=0,
            grid=grid,
            in_specs=[
                pl.BlockSpec((ts, col_tile), lambda i, j: (i, j)),
                pl.BlockSpec(const_block, const_map),   # constants stay VMEM-resident
                pl.BlockSpec(const_block, const_map),
            ],
            out_specs=pl.BlockSpec((ts, col_tile), lambda i, j: (i, j)),
        ),
        compiler_params=pltpu.CompilerParams(
            dimension_semantics=("parallel", "parallel"),
            vmem_limit_bytes=vmem_limit,
        ),
        input_output_aliases=({0: 0} if donate else {}),
    )(x2d, freq_col, offs_col)
    return out2d.reshape(S, B, D)


# -----------------------------------------------------------------------------
# Streaming path (B >= 8): pe tiles DMA'd from the buffer, broadcast-add over batch.
# -----------------------------------------------------------------------------
def _pe_add_kernel(x_ref, pe_ref, o_ref):
    # pe_ref is (ts, 1, D): broadcast over the batch (sublane) dim.
    o_ref[...] = (x_ref[...] + pe_ref[...]).astype(o_ref.dtype)


def _forward_streaming(x: jnp.ndarray, pe: jnp.ndarray, *, donate: bool = False) -> jnp.ndarray:
    S, B, D = x.shape
    itemsize = jnp.dtype(x.dtype).itemsize
    gran = _sublane_gran(x.dtype)
    target, vmem_limit = _tpu_budgets()

    # Batch (sublane) grid axis only if a single sequence position blows the budget.
    per_batch_bytes = _round_up(D, 128) * itemsize
    if _round_up(B, gran) * per_batch_bytes > target and B > gran:
        tb = max(gran, ((target // per_batch_bytes) // gran) * gran)
        tb = min(tb, (B // gran) * gran)
    else:
        tb = B
    row_bytes = _round_up(tb, gran) * per_batch_bytes
    ts = _pick_row_tile(S, row_bytes, 1, target)      # leading dim: no sublane constraint
    grid = (pl.cdiv(S, ts), pl.cdiv(B, tb))

    return pl.pallas_call(
        _pe_add_kernel,
        out_shape=jax.ShapeDtypeStruct((S, B, D), x.dtype),
        grid_spec=pltpu.PrefetchScalarGridSpec(
            num_scalar_prefetch=0,
            grid=grid,
            in_specs=[
                pl.BlockSpec((ts, tb, D), lambda i, j: (i, j, 0)),
                # First S rows of the full (max_len, 1, D) buffer are selected here,
                # inside the pipelined DMA stream (no wrapper-side pe[:S] copy).
                pl.BlockSpec((ts, 1, D), lambda i, j: (i, 0, 0)),
            ],
            out_specs=pl.BlockSpec((ts, tb, D), lambda i, j: (i, j, 0)),
        ),
        compiler_params=pltpu.CompilerParams(
            dimension_semantics=("parallel", "parallel"),
            vmem_limit_bytes=vmem_limit,
        ),
        input_output_aliases=({0: 0} if donate else {}),
    )(x, pe)


# -----------------------------------------------------------------------------
# Public forward (eval mode): out = x + pe[:S]
# -----------------------------------------------------------------------------
def positional_encoding_forward(x: jnp.ndarray, pe: jnp.ndarray, *,
                                donate: bool = False) -> jnp.ndarray:
    """x: (S, B, D); pe: (max_len, 1, D). Returns x + pe[:S] (dropout = identity/eval).

    Set donate=True only when x is dead after this op (enables in-place output aliasing).
    """
    S, B, D = x.shape
    if S > pe.shape[0]:
        raise ValueError(f"sequence length {S} exceeds max_len {pe.shape[0]}")
    if D != pe.shape[-1]:
        raise ValueError(f"d_model mismatch: x has {D}, pe has {pe.shape[-1]}")
    if B >= 8:
        # Streaming the tiny pe rows costs only ~1/B extra HBM read, needs zero
        # transcendental work, and matches the registered buffer exactly.
        return _forward_streaming(x, pe, donate=donate)
    # Small batch: rebuild pe in-kernel (no pe HBM stream, lane-dense stores).
    # NOTE: in-kernel f32 sin at very large positions can differ from the precomputed
    # buffer by ~1e-4 on the highest-frequency odd columns (f32 range reduction).
    return _forward_fused(x, donate=donate)


if __name__ == "__main__":
    # Small shapes consistent with the module: seq=8, batch=2, d_model=32.
    S, B, D = 8, 2, 32
    MAX_LEN = 64  # stand-in for max_len=5000 at small scale

    key = jax.random.PRNGKey(0)
    x = jax.random.normal(key, (S, B, D), dtype=jnp.float32)
    pe = make_positional_encoding(MAX_LEN, D)

    # Fused path (B < 8).
    out = jax.block_until_ready(positional_encoding_forward(x, pe))
    ref = x + pe[:S]
    assert out.shape == (S, B, D)
    assert jnp.allclose(out, ref, rtol=1e-5, atol=1e-5), "fused path mismatch vs reference"

    # Streaming path (B >= 8) at an equally small shape.
    x2 = jax.random.normal(jax.random.PRNGKey(1), (S, 8, D), dtype=jnp.float32)
    out2 = jax.block_until_ready(positional_encoding_forward(x2, pe))
    assert jnp.allclose(out2, x2 + pe[:S], rtol=1e-5, atol=1e-5), "streaming path mismatch"

    print("KERNEL_OK")
</pallas_src>

<mosaic_0001>
module attributes {stable_mosaic.version = 11 : i64} {
  func.func @_pe_fused_kernel(%arg0: i32, %arg1: i32, %arg2: memref<4x128xf32, #tpu.memory_space<vmem>>, %arg3: memref<1x128xf32, #tpu.memory_space<vmem>>, %arg4: memref<1x128xf32, #tpu.memory_space<vmem>>, %arg5: memref<4x128xf32, #tpu.memory_space<vmem>>) attributes {dimension_semantics = [#tpu.dimension_semantics<parallel>, #tpu.dimension_semantics<parallel>], iteration_bounds = array<i64: 1, 1>, scalar_prefetch = 0 : i64, scratch_operands = 0 : i64, tpu.core_type = #tpu.core_type<tc>, window_params = [{transform_indices = @transform_0, window_bounds = array<i64: 4, 128>}, {pipeline_mode = #tpu.pipeline_mode<synchronous>, transform_indices = @transform_1, window_bounds = array<i64: 1, 128>}, {pipeline_mode = #tpu.pipeline_mode<synchronous>, transform_indices = @transform_2, window_bounds = array<i64: 1, 128>}, {transform_indices = @transform_3, window_bounds = array<i64: 4, 128>}]} {
    %c4_i32 = arith.constant 4 : i32
    %0 = arith.muli %arg0, %c4_i32 : i32
    %1 = tpu.iota {dimensions = array<i32: 0>} : vector<4x1xi32>
    %2 = vector.broadcast %0 : i32 to vector<4x1xi32>
    %3 = arith.addi %2, %1 : vector<4x1xi32>
    %c2_i32 = arith.constant 2 : i32
    %4 = vector.broadcast %c2_i32 : i32 to vector<4x1xi32>
    %5 = arith.muli %3, %4 : vector<4x1xi32>
    %6 = arith.sitofp %5 : vector<4x1xi32> to vector<4x1xf32>
    %c0 = arith.constant 0 : index
    %c0_0 = arith.constant 0 : index
    %7 = vector.load %arg3[%c0, %c0_0] : memref<1x128xf32, #tpu.memory_space<vmem>>, vector<1x128xf32>
    %8 = vector.broadcast %6 : vector<4x1xf32> to vector<4x128xf32>
    %9 = vector.broadcast %7 : vector<1x128xf32> to vector<4x128xf32>
    %10 = arith.mulf %8, %9 : vector<4x128xf32>
    %c0_1 = arith.constant 0 : index
    %c0_2 = arith.constant 0 : index
    %11 = vector.load %arg4[%c0_1, %c0_2] : memref<1x128xf32, #tpu.memory_space<vmem>>, vector<1x128xf32>
    %12 = vector.broadcast %11 : vector<1x128xf32> to vector<4x128xf32>
    %13 = arith.addf %10, %12 : vector<4x128xf32>
    %14 = math.sin %13 : vector<4x128xf32>
    %c0_3 = arith.constant 0 : index
    %c0_4 = arith.constant 0 : index
    %15 = vector.load %arg2[%c0_3, %c0_4] : memref<4x128xf32, #tpu.memory_space<vmem>>, vector<4x128xf32>
    %16 = arith.addf %15, %14 : vector<4x128xf32>
    %c0_5 = arith.constant 0 : index
    %c0_6 = arith.constant 0 : index
    %17 = vector.load %arg5[%c0_5, %c0_6] : memref<4x128xf32, #tpu.memory_space<vmem>>, vector<4x128xf32>
    tpu.vector_store %arg5[%c0_5, %c0_6], %16 {strides = array<i32>} : memref<4x128xf32, #tpu.memory_space<vmem>>, vector<4x128xf32>,
    return
  }
  func.func @transform_0(%arg0: i32, %arg1: i32) -> (i32, i32) {
    %c0_i32 = arith.constant 0 : i32
    return %arg0, %arg1 : i32, i32
  }
  func.func @transform_1(%arg0: i32, %arg1: i32) -> (i32, i32) {
    %c0_i32 = arith.constant 0 : i32
    %c0_i32_0 = arith.constant 0 : i32
    %c0_i32_1 = arith.constant 0 : i32
    return %c0_i32, %c0_i32_0 : i32, i32
  }
  func.func @transform_2(%arg0: i32, %arg1: i32) -> (i32, i32) {
    %c0_i32 = arith.constant 0 : i32
    %c0_i32_0 = arith.constant 0 : i32
    %c0_i32_1 = arith.constant 0 : i32
    return %c0_i32, %c0_i32_0 : i32, i32
  }
  func.func @transform_3(%arg0: i32, %arg1: i32) -> (i32, i32) {
    %c0_i32 = arith.constant 0 : i32
    return %arg0, %arg1 : i32, i32
  }
}

</mosaic_0001>

<bundles_post_ra>
// kernel: tpu_custom_call.1
= control target key start
LH: loop header
LB: loop body
LE: loop exit
PB: predicated region body
PF: predicated region fallthrough
CT: control target
= control target key end

     0   :  { %8 = vsyncpa [#allocation3], 0  ;;  %s321_s0 = inlined_call_operand.hbm [shape: f32[4,128], index: 0, kind: input, shape index: {}]   ;;  %s322_s1 = inlined_call_operand.vmem [shape: f32[1,128], index: 1, kind: input, shape index: {}]   ;;  %s323_s2 = inlined_call_operand.vmem [shape: f32[1,128], index: 2, kind: input, shape index: {}]   ;;  %s324_s3 = inlined_call_operand.hbm [shape: f32[4,128], index: 3, kind: output, shape index: {}]  }
   0x1   :  { %9 = vsyncpa [#allocation4], 0  ;;  %s242_s12 = smov [#allocation2]   ;;  %s194_s16 = scalar_lea.hbm %s321_s0, 64 }
   0x2   :  { %s16_s13 = sshll.u32 %s242_s12, 4  ;;  %p195_p0 = scmp.ne.s32.totalorder %s321_s0, %s194_s16  ;;  %s17_s13 = int_to_ptr.vmem [resolvable:$true] %s16_s13 }
   0x3   :  { %p198_p1 = scmp.lt.u32.totalorder %s194_s16, %s321_s0 }
   0x5   :  { %p200_p2 = pnand %p198_p1, %p195_p0 }
   0x7   :  { %203 = shalt.err (!%p200_p2)
}
   0x8   :  { %s204_s21 = scalar_lea.vmem %s17_s13, 64  ;;  %p209_p4 = scmp.lt.s32.totalorder %s17_s13, %s17_s13 }
   0x9   :  { %p205_p3 = scmp.ne.s32.totalorder %s17_s13, %s204_s21  ;;  %p210_p5 = scmp.lt.s32.totalorder %s204_s21, %s204_s21 }
   0xb   :  { %p211_p6 = por %p210_p5, %p209_p4 }
   0xd   :  { %p212_p7 = pnand %p211_p6, %p205_p3 }
   0xf   :  { %215 = shalt.err (!%p212_p7)
}
  0x10   :  { %19 = dma.hbm_to_vmem [thread:$0]  %s321_s0, 64, %s17_s13, [#allocation3]  }
  0x11   :  { %238 = dma.done.wait [#allocation3], 64  }
  0x12   :  { %239 = vsyncadd [#allocation3], 4294967232  ;;  %v28_v0 = vlaneseq  ;;  %v172_v4 = vld [vmem:[%s322_s1] ss:$0 sm:$0xff]  ;;  %v243_v19 = vmov 683565275  }
  0x13   :  { %v173_v5 = vld [vmem:[%s323_s2] ss:$0 sm:$0xff]  ;;  %v244_v21 = vmov 2475754826   ;;  %v245_v23 = vmov 2131351028  }
  0x14   :  { %v29_v1 = vshrl.u32 %v28_v0, 7  ;;  %v246_v25 = vmov 2102212464   ;;  %v247_v27 = vmov 920167782   ;;  %s249_s0 = smov [#allocation5]  }
  0x15   :  { %v248_v34 = vmov 1326507024   ;;  %s163_s1 = sshll.u32 %s249_s0, 4  ;;  %s164_s1 = int_to_ptr.vmem [resolvable:$true] %s163_s1 }
  0x16   :  { %v32_v2 = vmul.u32 2, %v29_v1  ;;  %s216_s2 = scalar_lea.vmem %s164_s1, 64  ;;  %p221_p9 = scmp.lt.s32.totalorder %s164_s1, %s164_s1 }
  0x17   :  { %p217_p8 = scmp.ne.s32.totalorder %s164_s1, %s216_s2  ;;  %p222_p10 = scmp.lt.s32.totalorder %s216_s2, %s216_s2 }
  0x18   :  { %v33_v3 = vcvt.s32.f32 %v32_v2 }
  0x19   :  { %p223_p11 = por %p222_p10, %p221_p9 }
  0x1a   :  { %v41_v6 = vmul.f32 %v172_v4, %v33_v3 }
  0x1b   :  { %p224_p12 = pnand %p223_p11, %p217_p8 }
  0x1c   :  { %v288_v7 = vadd.f32 %v173_v5, %v41_v6 }
  0x1e   :  { %v53_v8 = vand.u32 2139095040, %v288_v7  ;;  %v50_v10 = vand.u32 2147483647, %v288_v7  ;;  %vm52_vm7 = vcmp.lt.s32.totalorder %v288_v7, 0  ;;  %vm142_vm12 = vweird.f32 %v288_v7 }
  0x20   :  { %v54_v9 = vshrl.u32 %v53_v8, 23  ;;  %v57_v13 = vand.u32 8388607, %v50_v10  ;;  %vm51_vm8 = vcmp.le.f32.partialorder %v50_v10, 0.7853982 }
  0x22   :  { %v174_v11 = vadd.s32 4294967169, %v54_v9  ;;  %v58_v16 = vor.u32 8388608, %v57_v13 }
  0x24   :  { %v60_v12 = vadd.s32 1, %v174_v11  ;;  %v98_v36 = vshll.u32 %v58_v16, 8 }
  0x26   :  { %vm61_vm0 = vcmp.gt.s32.totalorder %v60_v12, 0 }
  0x27   :  { %v62_v14 = vsel %vm61_vm0, %v60_v12, 0 }
  0x28   :  { %v64_v15 = vand.u32 31, %v62_v14  ;;  %v63_v17 = vshrl.u32 %v62_v14, 5 }
  0x2a   :  { %v65_v18 = vsub.s32 32, %v64_v15  ;;  %v67_v20 = vshll.u32 %v243_v19, %v64_v15  ;;  %v70_v22 = vshll.u32 %v244_v21, %v64_v15  ;;  %v73_v24 = vshll.u32 %v245_v23, %v64_v15 }
  0x2b   :  { %v76_v26 = vshll.u32 %v246_v25, %v64_v15  ;;  %v79_v28 = vshll.u32 %v247_v27, %v64_v15  ;;  %vm82_vm1 = vcmp.lt.s32.totalorder %v63_v17, 1  ;;  %vm85_vm2 = vcmp.lt.s32.totalorder %v63_v17, 4 }
  0x2c   :  { %v66_v29 = vshrl.u32 %v243_v19, %v65_v18  ;;  %v68_v30 = vshrl.u32 %v244_v21, %v65_v18  ;;  %v71_v31 = vshrl.u32 %v245_v23, %v65_v18  ;;  %v74_v32 = vshrl.u32 %v246_v25, %v65_v18 }
  0x2d   :  { %v77_v33 = vshrl.u32 %v247_v27, %v65_v18  ;;  %v80_v35 = vshrl.u32 %v248_v34, %v65_v18  ;;  %vm83_vm3 = vcmp.lt.s32.totalorder %v63_v17, 2  ;;  %vm84_vm4 = vcmp.lt.s32.totalorder %v63_v17, 3  ;;  %v154_v34 = vld [vmem:[#allocation2] sm:$0xf] }
  0x2e   :  { %v69_v37 = vor.u32 %v68_v30, %v67_v20  ;;  %v72_v38 = vor.u32 %v71_v31, %v70_v22  ;;  %v75_v39 = vor.u32 %v74_v32, %v73_v24 }
  0x2f   :  { %v78_v40 = vor.u32 %v77_v33, %v76_v26  ;;  %v81_v41 = vor.u32 %v80_v35, %v79_v28 }
  0x30   :  { %v86_v42 = vsel %vm82_vm1, %v66_v29, %v69_v37  ;;  %v87_v43 = vsel %vm85_vm2, %v75_v39, 2102212464  ;;  %v90_v44 = vsel %vm82_vm1, %v69_v37, %v72_v38  ;;  %v94_v45 = vsel %vm82_vm1, %v72_v38, %v75_v39 }
  0x31   :  { %v88_v46 = vsel %vm84_vm4, %v72_v38, %v87_v43  ;;  %v91_v47 = vsel %vm85_vm2, %v78_v40, 920167782  ;;  %v95_v48 = vsel %vm85_vm2, %v81_v41, 1326507024 }
  0x32   :  { %v92_v49 = vsel %vm84_vm4, %v75_v39, %v91_v47  ;;  %v96_v50 = vsel %vm84_vm4, %v78_v40, %v95_v48  ;;  %v89_v51 = vsel %vm83_vm3, %v86_v42, %v88_v46 }
  0x33   :  { %v93_v52 = vsel %vm83_vm3, %v90_v44, %v92_v49  ;;  %v97_v53 = vsel %vm83_vm3, %v94_v45, %v96_v50  ;;  %v105_v58 = vmul.u32 %v98_v36, %v89_v51 }
  0x34   :  { %v294_v54 = vmul.u32.u64.low %v98_v36, %v97_v53  ;;  %v295_v55 = vmul.u32.u64.high %v98_v36, %v97_v53, %v294_v54  ;;  %v297_v56 = vmul.u32.u64.low %v98_v36, %v93_v52  ;;  %v298_v57 = vmul.u32.u64.high %v98_v36, %v93_v52, %v297_v56 }
  0x36   :  { %vm107_vm5 = vc.u32 %v295_v55, %v297_v56  ;;  %v108_v59 = vadd.s32 1, %v298_v57  ;;  %v106_v6 = vadd.s32 %v297_v56, %v295_v55 }
  0x38   :  { %v109_v60 = vsel %vm107_vm5, %v108_v59, %v298_v57 }
  0x39   :  { %v110_v61 = vadd.s32 %v109_v60, %v105_v58 }
  0x3b   :  { %v111_v62 = vadd.s32 536870912, %v110_v61 }
  0x3d   :  { %v112_v63 = vshrl.u32 %v111_v62, 30 }
  0x3f   :  { %v113_v0 = vshll.u32 %v112_v63, 30  ;;  %v136_v20 = vsub.s32 4, %v112_v63 }
  0x41   :  { %v114_v1 = vsub.s32 %v110_v61, %v113_v0  ;;  %v137_v23 = vsel %vm52_vm7, %v136_v20, %v112_v63 }
  0x42   :  { %v139_v26 = vsel %vm51_vm8, 0, %v137_v23 }
  0x43   :  { %v116_v2 = vsub.s32 0, %v114_v1  ;;  %v143_v27 = vadd.s32 3, %v139_v26 }
  0x45   :  { %v175_v3 = vmin.u32 %v116_v2, %v114_v1  ;;  %v144_v28 = vand.u32 3, %v143_v27 }
  0x47   :  { %v118_v4 = vclz %v175_v3  ;;  %vm149_vm9 = vcmp.eq.s32.totalorder %v144_v28, 2  ;;  %vm146_vm10 = vcmp.eq.s32.totalorder %v144_v28, 0  ;;  %vm145_vm11 = vcmp.lt.s32.totalorder %v144_v28, 2 }
  0x49   :  { %v176_v5 = vadd.s32 4294967294, %v118_v4 }
  0x4b   :  { %vm177_vm6 = vcmp.lt.s32.totalorder %v176_v5, 0 }
  0x4c   :  { %v121_v8 = vsel %vm177_vm6, 0, %v176_v5 }
  0x4d   :  { %v122_v9 = vsub.s32 32, %v121_v8  ;;  %v123_v11 = vshll.u32 %v114_v1, %v121_v8  ;;  %v126_v12 = vsub.s32 4294967266, %v121_v8 }
  0x4f   :  { %v124_v13 = vshrl.u32 %v106_v6, %v122_v9  ;;  %v127_v14 = vadd.s32 127, %v126_v12 }
  0x51   :  { %v125_v15 = vor.u32 %v124_v13, %v123_v11  ;;  %v128_v16 = vshll.u32 %v127_v14, 23 }
  0x53   :  { %v129_v17 = vor.u32 4788187, %v128_v16  ;;  %v132_v18 = vcvt.s32.f32 %v125_v15 }
  0x55   :  { %v130_v19 = vand.u32 2147483647, %v129_v17 }
  0x57   :  { %v133_v21 = vmul.f32 %v132_v18, %v130_v19 }
  0x59   :  { %v134_v22 = vxor.u32 2147483648, %v133_v21 }
  0x5b   :  { %v135_v24 = vsel %vm52_vm7, %v134_v22, %v133_v21 }
  0x5c   :  { %v138_v25 = vsel %vm51_vm8, %v288_v7, %v135_v24 }
  0x5d   :  { %190 = vcosq.f32 %v138_v25 }
  0x5e   :  { %192 = vsinq.f32 %v138_v25 }
  0x67   :  { %v191_v29 = vpop.eup %190 }
  0x68   :  { %v193_v30 = vpop.eup %192  ;;  %v150_v31 = vxor.u32 2147483648, %v191_v29 }
  0x69   :  { %v147_v32 = vxor.u32 2147483648, %v193_v30 }
  0x6a   :  { %v151_v10 = vsel %vm149_vm9, %v150_v31, %v193_v30 }
  0x6b   :  { %v148_v33 = vsel %vm146_vm10, %v191_v29, %v147_v32 }
  0x6c   :  { %v152_v35 = vsel %vm145_vm11, %v148_v33, %v151_v10 }
  0x6d   :  { %v153_v36 = vsel %vm142_vm12, nan, %v152_v35 }
  0x6e   :  { %v155_v37 = vadd.f32 %v154_v34, %v153_v36 }
  0x70   :  { %156 = vst [vmem:[#allocation5] sm:$0xf] %v155_v37 }
  0x71   :  { %227 = shalt.err (!%p224_p12)
}
  0x72   :  { %s228_s30 = scalar_lea.hbm %s324_s3, 64 }
  0x73   :  { %p229_p13 = scmp.ne.s32.totalorder %s324_s3, %s228_s30  ;;  %p232_p0 = scmp.lt.u32.totalorder %s228_s30, %s324_s3 }
  0x75   :  { %p234_p1 = pnand %p232_p0, %p229_p13 }
  0x77   :  { %237 = shalt.err (!%p234_p1)
}
  0x78   :  { %166 = dma.vmem_to_hbm [thread:$0]  %s164_s1, 64, %s324_s3, [#allocation4]  }
  0x79   :  { %240 = dma.done.wait [#allocation4], 64  }
  0x7a   :  { %241 = vsyncadd [#allocation4], 4294967232 }
  0x7b   :  { %170 = vsyncpa [#allocation3], 1 }
  0x7c   :  { %171 = vsyncpa [#allocation4], 1 }

</bundles_post_ra>
